<compile_context>
chip_gen: v7x
topology: tpu7x:2x2x1
jax: 0.10.0
libtpu: 0.0.40
codegen_flags: <defaults>
</compile_context>

<pallas_src>
import jax
import jax.numpy as jnp
from jax.experimental import pallas as pl
from jax.experimental.pallas import tpu as pltpu


def koopman_kernel(x_ref, wt_ref, u_ref, o_ref):
    # y = x @ Wt + u  (Wt = W.T pre-transposed in the wrapper; nn.Linear semantics).
    xv = x_ref[...]
    if xv.dtype != wt_ref.dtype:                 # in-kernel cast (bf16 compute path)
        xv = xv.astype(wt_ref.dtype)
    y = jnp.dot(xv, wt_ref[...], preferred_element_type=jnp.float32)
    o_ref[...] = (y + u_ref[...].astype(jnp.float32)).astype(o_ref.dtype)


def _round_up(x, m):
    return ((x + m - 1) // m) * m


def _vmem_capacity_bytes():
    try:
        info = pltpu.get_tpu_info()
        cap = getattr(info, "vmem_capacity_bytes", None)
        if cap:
            return int(cap)
    except Exception:
        pass
    return 64 << 20  # conservative fallback (v7x per-TC VMEM)


def _bspec(shape, index_map, mode=None):
    if mode is None:
        return pl.BlockSpec(shape, index_map)
    return pl.BlockSpec(shape, index_map, pipeline_mode=mode)


def koopman_control(x, u, W, *, compute_dtype=None):
    """x, u: [B, nx]; W: [nx, nx] (PyTorch [out, in] layout). Returns K(x) + u."""
    B, nx = x.shape
    assert u.shape == (B, nx) and W.shape == (nx, nx)
    out_dtype = x.dtype
    cdt = jnp.dtype(compute_dtype) if compute_dtype is not None else jnp.dtype(W.dtype)
    isz = lambda dt: jnp.dtype(dt).itemsize

    # One-time XLA transpose + cast of the (small, per-call-constant) Koopman operator;
    # the kernel then sees a standard, non-transposed RHS -> clean MXU feed every step.
    wt = W.T.astype(cdt)

    vmem_cap = _vmem_capacity_bytes()

    # --- batch tiling ------------------------------------------------------------
    # Target a few MiB of x per tile (128 MiB chips get bigger tiles), multiple of 8
    # sublanes; force >=2 grid steps once B >= 256 so v7x megacore can split the grid.
    row_bytes = nx * isz(x.dtype)
    target_tile_bytes = (6 << 20) if vmem_cap >= (96 << 20) else (3 << 20)
    tile_b = max(8, (target_tile_bytes // max(row_bytes, 1)) // 8 * 8)
    tile_b = min(tile_b, 4096)
    if B >= 256:
        tile_b = min(tile_b, _round_up(pl.cdiv(B, 2), 8))
    if tile_b >= B:
        tile_b = B  # single full-array block (always legal, even if B % 8 != 0)
    grid_b = pl.cdiv(B, tile_b)  # ragged last block: OOB output rows are masked on write

    # --- pipeline depths ---------------------------------------------------------
    tiny_tiles = (tile_b * row_bytes) < (512 << 10)
    xu_mode = pl.Buffered(3) if (tiny_tiles and grid_b >= 3) else None
    w_bytes = nx * nx * isz(cdt)
    w_mode = pl.Buffered(1) if (2 * w_bytes > vmem_cap // 4) else None

    # --- VMEM budget from the actual tile footprint (+ Mosaic scratch headroom) ---
    xu_bufs = 3 if xu_mode is not None else 2
    w_bufs = 1 if w_mode is not None else 2
    needed = (xu_bufs * tile_b * nx * (isz(x.dtype) + isz(u.dtype))
              + 2 * tile_b * nx * isz(out_dtype)
              + w_bufs * w_bytes
              + (4 << 20))
    vmem_limit = int(min(max(needed, 16 << 20), int(vmem_cap * 0.85)))

    return pl.pallas_call(
        koopman_kernel,
        out_shape=jax.ShapeDtypeStruct((B, nx), out_dtype),
        grid_spec=pltpu.PrefetchScalarGridSpec(
            num_scalar_prefetch=0,
            grid=(grid_b,),
            in_specs=[
                _bspec((tile_b, nx), lambda i: (i, 0), xu_mode),  # x tile (native dtype)
                _bspec((nx, nx), lambda i: (0, 0), w_mode),       # Wt (resident operator)
                _bspec((tile_b, nx), lambda i: (i, 0), xu_mode),  # u tile
            ],
            out_specs=pl.BlockSpec((tile_b, nx), lambda i: (i, 0)),
        ),
        compiler_params=pltpu.CompilerParams(
            dimension_semantics=("parallel",),   # megacore sharding on v7x
            vmem_limit_bytes=vmem_limit,
        ),
    )(x, wt, u)


if __name__ == "__main__":
    key = jax.random.PRNGKey(0)
    kx, ku, kw, kx2, ku2, kw2 = jax.random.split(key, 6)

    # --- small example consistent with the module: x,u [batchsize, nx], K = Linear(nx, nx)
    B, nx = 16, 32
    x = jax.random.normal(kx, (B, nx), dtype=jnp.float32)
    u = jax.random.normal(ku, (B, nx), dtype=jnp.float32)
    W = jax.random.normal(kw, (nx, nx), dtype=jnp.float32) * (1.0 / jnp.sqrt(nx))

    y = jax.block_until_ready(koopman_control(x, u, W))
    y_ref = x @ W.T + u
    assert jnp.allclose(y, y_ref, atol=1e-5, rtol=1e-5), "f32 mismatch vs reference"

    # --- bf16 compute path (in-kernel x cast, f32 accumulate), looser tolerance
    y_bf16 = jax.block_until_ready(koopman_control(x, u, W, compute_dtype=jnp.bfloat16))
    assert jnp.allclose(y_bf16, y_ref, atol=1e-1, rtol=1e-1), "bf16 mismatch vs reference"

    # --- tiled path with a ragged (non-divisible) last block, lane-dense nx
    B2, nx2 = 600, 128
    x2 = jax.random.normal(kx2, (B2, nx2), dtype=jnp.float32)
    u2 = jax.random.normal(ku2, (B2, nx2), dtype=jnp.float32)
    W2 = jax.random.normal(kw2, (nx2, nx2), dtype=jnp.float32) * (1.0 / jnp.sqrt(nx2))
    y2 = jax.block_until_ready(koopman_control(x2, u2, W2))
    y2_ref = x2 @ W2.T + u2
    assert y2.shape == (B2, nx2)
    assert bool(jnp.all(jnp.isfinite(y2))), "NaN/Inf leaked from ragged last block"
    assert jnp.allclose(y2, y2_ref, atol=1e-4, rtol=1e-4), "ragged-tile mismatch vs reference"

    print("KERNEL_OK")
</pallas_src>

<mosaic_0001>
module attributes {stable_mosaic.version = 11 : i64} {
  func.func @koopman_kernel(%arg0: i32, %arg1: memref<16x32xf32, #tpu.memory_space<vmem>>, %arg2: memref<32x32xf32, #tpu.memory_space<vmem>>, %arg3: memref<16x32xf32, #tpu.memory_space<vmem>>, %arg4: memref<16x32xf32, #tpu.memory_space<vmem>>) attributes {dimension_semantics = [#tpu.dimension_semantics<parallel>], iteration_bounds = array<i64: 1>, scalar_prefetch = 0 : i64, scratch_operands = 0 : i64, tpu.core_type = #tpu.core_type<tc>, window_params = [{transform_indices = @transform_0, window_bounds = array<i64: 16, 32>}, {pipeline_mode = #tpu.pipeline_mode<synchronous>, transform_indices = @transform_1, window_bounds = array<i64: 32, 32>}, {transform_indices = @transform_2, window_bounds = array<i64: 16, 32>}, {transform_indices = @transform_3, window_bounds = array<i64: 16, 32>}]} {
    %c0 = arith.constant 0 : index
    %c0_0 = arith.constant 0 : index
    %0 = vector.load %arg1[%c0, %c0_0] : memref<16x32xf32, #tpu.memory_space<vmem>>, vector<16x32xf32>
    %c0_1 = arith.constant 0 : index
    %c0_2 = arith.constant 0 : index
    %1 = vector.load %arg2[%c0_1, %c0_2] : memref<32x32xf32, #tpu.memory_space<vmem>>, vector<32x32xf32>
    %cst = arith.constant dense<0.000000e+00> : vector<16x32xf32>
    %2 = tpu.matmul %0, %1, %cst {dimension_numbers = #tpu.dot_dimension_numbers<[1], [0], [0], [1], [0, 0, 1, 1], [], []>} : vector<16x32xf32>, vector<32x32xf32>, vector<16x32xf32> -> vector<16x32xf32>
    %c0_3 = arith.constant 0 : index
    %c0_4 = arith.constant 0 : index
    %3 = vector.load %arg3[%c0_3, %c0_4] : memref<16x32xf32, #tpu.memory_space<vmem>>, vector<16x32xf32>
    %4 = arith.addf %2, %3 : vector<16x32xf32>
    %c0_5 = arith.constant 0 : index
    %c0_6 = arith.constant 0 : index
    %5 = vector.load %arg4[%c0_5, %c0_6] : memref<16x32xf32, #tpu.memory_space<vmem>>, vector<16x32xf32>
    tpu.vector_store %arg4[%c0_5, %c0_6], %4 {strides = array<i32>} : memref<16x32xf32, #tpu.memory_space<vmem>>, vector<16x32xf32>,
    return
  }
  func.func @transform_0(%arg0: i32) -> (i32, i32) {
    %c0_i32 = arith.constant 0 : i32
    %c0_i32_0 = arith.constant 0 : i32
    return %arg0, %c0_i32 : i32, i32
  }
  func.func @transform_1(%arg0: i32) -> (i32, i32) {
    %c0_i32 = arith.constant 0 : i32
    %c0_i32_0 = arith.constant 0 : i32
    %c0_i32_1 = arith.constant 0 : i32
    return %c0_i32, %c0_i32_0 : i32, i32
  }
  func.func @transform_2(%arg0: i32) -> (i32, i32) {
    %c0_i32 = arith.constant 0 : i32
    %c0_i32_0 = arith.constant 0 : i32
    return %arg0, %c0_i32 : i32, i32
  }
  func.func @transform_3(%arg0: i32) -> (i32, i32) {
    %c0_i32 = arith.constant 0 : i32
    %c0_i32_0 = arith.constant 0 : i32
    return %arg0, %c0_i32 : i32, i32
  }
}

</mosaic_0001>

<bundles_post_ra>
// kernel: tpu_custom_call.1
= control target key start
LH: loop header
LB: loop body
LE: loop exit
PB: predicated region body
PF: predicated region fallthrough
CT: control target
= control target key end

     0   :  { %8 = vsyncpa [#allocation3], 0  ;;  %s390_s0 = inlined_call_operand.hbm [shape: f32[16,32], index: 0, kind: input, shape index: {}]   ;;  %s391_s1 = inlined_call_operand.hbm [shape: f32[32,32], index: 1, kind: input, shape index: {}]   ;;  %s392_s2 = inlined_call_operand.hbm [shape: f32[16,32], index: 2, kind: input, shape index: {}]   ;;  %s393_s3 = inlined_call_operand.hbm [shape: f32[16,32], index: 3, kind: output, shape index: {}]  }
   0x1   :  { %9 = vsyncpa [#allocation6], 0 }
   0x2   :  { %10 = vsyncpa [#allocation4], 0  ;;  %s293_s12 = smov [#allocation5]   ;;  %s294_s14 = smov [#allocation2]  }
   0x3   :  { %s28_s13 = sshll.u32 %s293_s12, 4  ;;  %s16_s15 = sshll.u32 %s294_s14, 4  ;;  %s29_s13 = int_to_ptr.vmem [resolvable:$true] %s28_s13  ;;  %s319_s15 = int_to_ptr.vmem [resolvable:$true] %s16_s15 }
   0x4   :  { %s199_s18 = scalar_lea.hbm %s391_s1, 512 }
   0x5   :  { %p200_p0 = scmp.ne.s32.totalorder %s391_s1, %s199_s18  ;;  %p203_p1 = scmp.lt.u32.totalorder %s199_s18, %s391_s1 }
   0x7   :  { %p205_p2 = pnand %p203_p1, %p200_p0 }
   0x9   :  { %208 = shalt.err (!%p205_p2)
}
   0xa   :  { %s209_s23 = scalar_lea.vmem %s29_s13, 512  ;;  %p214_p4 = scmp.lt.s32.totalorder %s29_s13, %s29_s13 }
   0xb   :  { %p210_p3 = scmp.ne.s32.totalorder %s29_s13, %s209_s23  ;;  %p215_p5 = scmp.lt.s32.totalorder %s209_s23, %s209_s23 }
   0xd   :  { %p216_p6 = por %p215_p5, %p214_p4 }
   0xf   :  { %p217_p7 = pnand %p216_p6, %p210_p3 }
  0x11   :  { %220 = shalt.err (!%p217_p7)
}
  0x12   :  { %s295_s24 = smov 128   ;;  %s296_s25 = smov 8  }
  0x13   :  { %34 = dma.hbm_to_vmem [thread:$0]  %s391_s1, 512, %s29_s13, [#allocation6], %s295_s24, %s295_s24, %s296_s25  }
  0x14   :  { %s221_s30 = scalar_lea.hbm %s390_s0, 256 }
  0x15   :  { %p222_p8 = scmp.ne.s32.totalorder %s390_s0, %s221_s30  ;;  %p225_p9 = scmp.lt.u32.totalorder %s221_s30, %s390_s0 }
  0x17   :  { %p227_p10 = pnand %p225_p9, %p222_p8 }
  0x19   :  { %230 = shalt.err (!%p227_p10)
}
  0x1a   :  { %s231_s8 = scalar_lea.vmem %s319_s15, 256  ;;  %p236_p12 = scmp.lt.s32.totalorder %s319_s15, %s319_s15 }
  0x1b   :  { %p232_p11 = scmp.ne.s32.totalorder %s319_s15, %s231_s8  ;;  %p237_p13 = scmp.lt.s32.totalorder %s231_s8, %s231_s8 }
  0x1d   :  { %p238_p0 = por %p237_p13, %p236_p12 }
  0x1f   :  { %p239_p1 = pnand %p238_p0, %p232_p11 }
  0x21   :  { %242 = shalt.err (!%p239_p1)
}
  0x22   :  { %22 = dma.hbm_to_vmem [thread:$0]  %s390_s0, 256, %s319_s15, [#allocation3], %s295_s24, %s295_s24, %s296_s25  }
  0x23   :  { %s297_s10 = smov [#allocation7]   ;;  %s243_s14 = scalar_lea.hbm %s392_s2, 256 }
  0x24   :  { %s40_s11 = sshll.u32 %s297_s10, 4  ;;  %p244_p2 = scmp.ne.s32.totalorder %s392_s2, %s243_s14  ;;  %s41_s11 = int_to_ptr.vmem [resolvable:$true] %s40_s11 }
  0x25   :  { %p247_p3 = scmp.lt.u32.totalorder %s243_s14, %s392_s2 }
  0x27   :  { %p249_p4 = pnand %p247_p3, %p244_p2 }
  0x29   :  { %252 = shalt.err (!%p249_p4)
}
  0x2a   :  { %s253_s20 = scalar_lea.vmem %s41_s11, 256  ;;  %p258_p6 = scmp.lt.s32.totalorder %s41_s11, %s41_s11 }
  0x2b   :  { %p254_p5 = scmp.ne.s32.totalorder %s41_s11, %s253_s20  ;;  %p259_p7 = scmp.lt.s32.totalorder %s253_s20, %s253_s20 }
  0x2d   :  { %p260_p8 = por %p259_p7, %p258_p6 }
  0x2f   :  { %p261_p9 = pnand %p260_p8, %p254_p5 }
  0x31   :  { %264 = shalt.err (!%p261_p9)
}
  0x32   :  { %46 = dma.hbm_to_vmem [thread:$0]  %s392_s2, 256, %s41_s11, [#allocation6], %s295_s24, %s295_s24, %s296_s25  }
  0x33   :  { %287 = dma.done.wait [#allocation3], 256  }
  0x34   :  { %288 = vsyncadd [#allocation3], 4294967040 }
  0x35   :  { %289 = dma.done.wait [#allocation6], 768  }
  0x36   :  { %290 = vsyncadd [#allocation6], 4294966528  ;;  %vm64_vm0 = vcmask 261120   ;;  %v58_v0 = vld [vmem:[#allocation5] sm:$0xff]  ;;  %v59_v1 = vld [vmem:[#allocation5 + $0x8] sm:$0xff]  ;;  %s298_s2 = smov [#allocation8]  }
  0x37   :  { %v60_v2 = vld [vmem:[#allocation5 + $0x10] sm:$0xff]  ;;  %v185_v3 = vpack.c.bf16 %v59_v1, %v58_v0  ;;  %v61_v4 = vld [vmem:[#allocation5 + $0x18] sm:$0xff]  ;;  %v63_v8 = vld [vmem:[#allocation7 + $0x8] sm:$0xff]  ;;  %s153_s21 = sshll.u32 %s298_s2, 4  ;;  %s154_s21 = int_to_ptr.vmem [resolvable:$true] %s153_s21 }
  0x38   :  { %v56_v5 = vld [vmem:[#allocation2] sm:$0xff]  ;;  %v189_v6 = vpack.c.bf16 %v61_v4, %v60_v2  ;;  %v57_v7 = vld [vmem:[#allocation2 + $0x8] sm:$0xff]  ;;  %v62_v9 = vld [vmem:[#allocation7] sm:$0xff]  ;;  %s265_s22 = scalar_lea.vmem %s154_s21, 256  ;;  %p270_p11 = scmp.lt.s32.totalorder %s154_s21, %s154_s21 }
  0x39   :  { %182 = vmatprep.mubr.msk.f32.mxu0 %vm64_vm0, %v56_v5  ;;  %186 = vmatprep.subr.bf16.mxu0 %v185_v3  ;;  %p266_p10 = scmp.ne.s32.totalorder %s154_s21, %s265_s22  ;;  %p271_p12 = scmp.lt.s32.totalorder %s265_s22, %s265_s22 }
  0x3a   :  { %188 = vmatpush3.bf16.msra.mxu0 %v185_v3 }
  0x3b   :  { %190 = vmatprep.subr.bf16.mxu0 %v189_v6  ;;  %p272_p13 = por %p271_p12, %p270_p11 }
  0x3d   :  { %p273_p0 = pnand %p272_p13, %p266_p10 }
  0x3e   :  { %192 = vmatpush3.bf16.msra.mxu0 %v189_v6 }
  0x41   :  { %183 = vmatmul.mubr.msk.f32.vlgmr.msra.gmra.mrb[0].mxu0 %vm64_vm0, %v57_v7 }
 0x114   :  { %v184_v10 = vpop.f32.mrb[0].mxu0 }
 0x115   :  { %v143_v11 = vadd.f32 %v184_v10, %v63_v8  ;;  %v137_v12 = vpop.f32.mrb[1].mxu0 }
 0x116   :  { %v138_v13 = vadd.f32 %v137_v12, %v62_v9 }
 0x117   :  { %147 = vst.msk [vmem:[#allocation8 + $0x8] sm:$0xff] %vm64_vm0, %v143_v11 }
 0x118   :  { %146 = vst.msk [vmem:[#allocation8] sm:$0xff] %vm64_vm0, %v138_v13 }
 0x119   :  { %276 = shalt.err (!%p273_p0)
}
 0x11a   :  { %s277_s27 = scalar_lea.hbm %s393_s3, 256 }
 0x11b   :  { %p278_p1 = scmp.ne.s32.totalorder %s393_s3, %s277_s27  ;;  %p281_p2 = scmp.lt.u32.totalorder %s277_s27, %s393_s3 }
 0x11d   :  { %p283_p3 = pnand %p281_p2, %p278_p1 }
 0x11f   :  { %286 = shalt.err (!%p283_p3)
}
 0x120   :  { %159 = dma.vmem_to_hbm [thread:$0]  %s154_s21, 256, %s393_s3, [#allocation4], %s295_s24, %s295_s24, %s296_s25  }
 0x121   :  { %291 = dma.done.wait [#allocation4], 256  }
 0x122   :  { %292 = vsyncadd [#allocation4], 4294967040 }
 0x123   :  { %163 = vsyncpa [#allocation3], 1 }
 0x124   :  { %164 = vsyncpa [#allocation6], 1 }
 0x125   :  { %165 = vsyncpa [#allocation4], 1 }

</bundles_post_ra>
